<compile_context>
chip_gen: v7x
topology: tpu7x:2x2x1
jax: 0.10.0
libtpu: 0.0.40
codegen_flags: <defaults>
</compile_context>

<pallas_src>
import jax
import jax.numpy as jnp
from jax.experimental import pallas as pl
from jax.experimental.pallas import tpu as pltpu


def _make_nll_partial_kernel(batch_total: int, ignore_index: int):
    """Kernel computing per-(row-tile, class-tile) partial sums of gathered log-probs."""

    def kernel(cls_ref, pred_ref, tgt_ref, out_ref):
        # cls_ref:  (1, TC) int32 global class ids for this class tile (tiny resident input)
        # pred_ref: (TB, TC) log-probs in native dtype (f32 or bf16)
        # tgt_ref:  (TB, 1) int32 class indices
        # out_ref:  (1, 1, TC) f32 partial sums for this tile
        TB = pred_ref.shape[0]
        row0 = pl.program_id(0) * TB

        tgt = tgt_ref[...]                                              # (TB, 1)
        rows = jax.lax.broadcasted_iota(jnp.int32, (TB, 1), 0) + row0
        valid = (rows < batch_total) & (tgt != ignore_index)            # (TB, 1) ops only
        # Fold validity into the target so the (TB, TC) compare needs no extra AND pass:
        # -1 never matches a real class id, so invalid / ragged-padded rows contribute 0.
        tgt_eff = jnp.where(valid, tgt, jnp.int32(-1))                  # (TB, 1)

        # One-hot gather against the resident global class ids (no per-tile (TB,TC) iota).
        # Select in the native dtype (bf16 stays packed, halving vreg pressure on v6e/v7x),
        # accumulate the row (sublane) reduction in f32 to preserve precision.
        onehot = cls_ref[...] == tgt_eff                                # (TB, TC) bool
        picked = jnp.where(onehot, pred_ref[...], jnp.zeros((), pred_ref.dtype))
        out_ref[...] = jnp.sum(picked, axis=0, keepdims=True, dtype=jnp.float32)[None]

    return kernel


def _choose_tiles(B: int, C: int, itemsize: int,
                  block_rows: int | None, block_cols: int | None):
    """Pick (TB, TC) keeping ~2-3 MiB per pipeline stage and >=2 row tiles when B > 8."""
    # --- class tile ---
    MAX_TC = 2048  # 128-multiple; bounds VMEM for vocab-sized C
    if block_cols is not None:
        TC = C if block_cols >= C else max(128, (int(block_cols) // 128) * 128)
    else:
        TC = C if C <= MAX_TC else MAX_TC

    # --- row tile ---
    if block_rows is not None:
        tb = int(block_rows)
    else:
        budget_per_stage = 3 * 1024 * 1024              # x2 double-buffering ~= 6 MiB of blocks
        per_row_bytes = TC * itemsize + 128 * 4         # pred row + padded (TB,1)->(TB,128) target
        tb = budget_per_stage // max(per_row_bytes, 1)
        tb = min(tb, 512)
        if B > 8:
            # ensure >=2 row tiles so both v7x TensorCores get work via the parallel axis
            tb = min(tb, max(8, (B // 2 // 8) * 8))
    TB = B if tb >= B else max(8, (tb // 8) * 8)        # sublane-aligned unless single tile

    n_rows = -(-B // TB)
    n_cls = -(-C // TC)
    return TB, TC, n_rows, n_cls


def _vmem_limit_bytes(TB: int, TC: int, itemsize: int) -> int:
    """Explicit scoped-VMEM budget: double-buffered blocks + temporaries + headroom."""
    pred_blk = TB * TC * itemsize
    tgt_blk = TB * 128 * 4           # (TB, 1) int32 pads to (TB, 128) in VMEM
    cls_blk = 8 * TC * 4             # (1, TC) int32 pads sublanes to 8
    out_blk = 8 * TC * 4             # (1, 1, TC) f32 pads sublanes to 8
    blocks = 2 * (pred_blk + tgt_blk + cls_blk + out_blk)
    temps = 3 * TB * TC * 4          # onehot / picked / f32 accumulation, conservative
    limit = blocks + temps + (2 << 20)
    return int(min(max(limit, 8 << 20), 48 << 20))


def nll_loss_mean(pred, target, ignore_index: int = -100,
                  block_rows: int | None = None, block_cols: int | None = None):
    """pred: (B, C) log-probabilities (f32 or bf16); target: (B,) integer labels.

    Matches F.nll_loss(pred, target) with the module defaults
    (weight=None, reduction='mean', ignore_index=-100).
    """
    # TODO(synk): non-default weight= / reduction= modes of nn.NLLLoss are not implemented.
    B, C = pred.shape
    tgt2d = target.astype(jnp.int32).reshape(B, 1)       # int64 targets truncated to int32
    cls_ids = jnp.arange(C, dtype=jnp.int32).reshape(1, C)

    itemsize = jnp.dtype(pred.dtype).itemsize
    TB, TC, n_rows, n_cls = _choose_tiles(B, C, itemsize, block_rows, block_cols)

    partials = pl.pallas_call(
        _make_nll_partial_kernel(B, ignore_index),
        out_shape=jax.ShapeDtypeStruct((n_rows, 1, C), jnp.float32),
        grid=(n_rows, n_cls),
        in_specs=[
            pl.BlockSpec((1, TC), lambda i, j: (0, j)),    # resident class ids
            pl.BlockSpec((TB, TC), lambda i, j: (i, j)),   # streamed pred tiles
            pl.BlockSpec((TB, 1), lambda i, j: (i, 0)),    # matching target rows
        ],
        out_specs=pl.BlockSpec((1, 1, TC), lambda i, j: (i, 0, j)),
        compiler_params=pltpu.CompilerParams(
            dimension_semantics=("parallel", "parallel"),
            vmem_limit_bytes=_vmem_limit_bytes(TB, TC, itemsize),
        ),
    )(cls_ids, pred, tgt2d)

    total = jnp.sum(partials)   # tiny final reduce over (n_rows, 1, C)
    # reduction='mean' with weight=None: divide by the number of non-ignored rows.
    count = jnp.sum((target.astype(jnp.int32) != jnp.int32(ignore_index)).astype(jnp.float32))
    return -(total / count)


if __name__ == "__main__":
    key = jax.random.PRNGKey(0)
    k1, k2, k3, k4, k5, k6 = jax.random.split(key, 6)

    # Case 1: f32 pred, single tile (batch=8, num_classes=16).
    B, C = 8, 16
    logits = jax.random.normal(k1, (B, C), dtype=jnp.float32)
    pred = jax.nn.log_softmax(logits, axis=-1)
    target = jax.random.randint(k2, (B,), 0, C, dtype=jnp.int32)

    loss = jax.block_until_ready(nll_loss_mean(pred, target))
    ref = -jnp.mean(pred[jnp.arange(B), target])
    assert jnp.allclose(loss, ref, atol=1e-6), (loss, ref)

    # Case 2: bf16 pred, multiple row tiles with a ragged last tile and an ignored row.
    B2, C2 = 20, 24
    logits2 = jax.random.normal(k3, (B2, C2), dtype=jnp.float32)
    pred2 = jax.nn.log_softmax(logits2, axis=-1).astype(jnp.bfloat16)
    target2 = jax.random.randint(k4, (B2,), 0, C2, dtype=jnp.int32)
    target2 = target2.at[3].set(-100)  # PyTorch default ignore_index

    loss2 = jax.block_until_ready(nll_loss_mean(pred2, target2, block_rows=8))

    pred2_f32 = pred2.astype(jnp.float32)
    valid2 = target2 != -100
    gathered2 = pred2_f32[jnp.arange(B2), jnp.clip(target2, 0, C2 - 1)]
    ref2 = -(jnp.sum(jnp.where(valid2, gathered2, 0.0)) / jnp.sum(valid2))
    assert jnp.allclose(loss2, ref2, atol=1e-5, rtol=1e-5), (loss2, ref2)

    # Case 3: exercise the class-tiling path (2 row tiles x 2 class tiles).
    B3, C3 = 16, 256
    logits3 = jax.random.normal(k5, (B3, C3), dtype=jnp.float32)
    pred3 = jax.nn.log_softmax(logits3, axis=-1)
    target3 = jax.random.randint(k6, (B3,), 0, C3, dtype=jnp.int32)
    target3 = target3.at[5].set(-100)

    loss3 = jax.block_until_ready(nll_loss_mean(pred3, target3, block_rows=8, block_cols=128))

    valid3 = target3 != -100
    gathered3 = pred3[jnp.arange(B3), jnp.clip(target3, 0, C3 - 1)]
    ref3 = -(jnp.sum(jnp.where(valid3, gathered3, 0.0)) / jnp.sum(valid3))
    assert jnp.allclose(loss3, ref3, atol=1e-6, rtol=1e-6), (loss3, ref3)

    print("KERNEL_OK")
</pallas_src>

<mosaic_0001>
module attributes {stable_mosaic.version = 11 : i64} {
  func.func @kernel(%arg0: i32, %arg1: i32, %arg2: memref<1x16xi32, #tpu.memory_space<vmem>>, %arg3: memref<8x16xf32, #tpu.memory_space<vmem>>, %arg4: memref<8x1xi32, #tpu.memory_space<vmem>>, %arg5: memref<1x1x16xf32, #tpu.memory_space<vmem>>) attributes {dimension_semantics = [#tpu.dimension_semantics<parallel>, #tpu.dimension_semantics<parallel>], iteration_bounds = array<i64: 1, 1>, scalar_prefetch = 0 : i64, scratch_operands = 0 : i64, tpu.core_type = #tpu.core_type<tc>, window_params = [{transform_indices = @transform_0, window_bounds = array<i64: 1, 16>}, {transform_indices = @transform_1, window_bounds = array<i64: 8, 16>}, {transform_indices = @transform_2, window_bounds = array<i64: 8, 1>}, {transform_indices = @transform_3, window_bounds = array<i64: 1, 1, 16>}]} {
    %c8_i32 = arith.constant 8 : i32
    %0 = arith.muli %arg0, %c8_i32 : i32
    %c0 = arith.constant 0 : index
    %c0_0 = arith.constant 0 : index
    %1 = vector.load %arg4[%c0, %c0_0] : memref<8x1xi32, #tpu.memory_space<vmem>>, vector<8x1xi32>
    %2 = tpu.iota {dimensions = array<i32: 0>} : vector<8x1xi32>
    %3 = vector.broadcast %0 : i32 to vector<8x1xi32>
    %4 = arith.addi %2, %3 : vector<8x1xi32>
    %c8_i32_1 = arith.constant 8 : i32
    %5 = vector.broadcast %c8_i32_1 : i32 to vector<8x1xi32>
    %6 = arith.cmpi slt, %4, %5 : vector<8x1xi32>
    %c-100_i32 = arith.constant -100 : i32
    %7 = vector.broadcast %c-100_i32 : i32 to vector<8x1xi32>
    %8 = arith.cmpi ne, %1, %7 : vector<8x1xi32>
    %9 = arith.andi %6, %8 : vector<8x1xi1>
    %c-1_i32 = arith.constant -1 : i32
    %10 = vector.broadcast %c-1_i32 : i32 to vector<8x1xi32>
    %11 = arith.select %9, %1, %10 : vector<8x1xi1>, vector<8x1xi32>
    %c0_2 = arith.constant 0 : index
    %c0_3 = arith.constant 0 : index
    %12 = vector.load %arg2[%c0_2, %c0_3] : memref<1x16xi32, #tpu.memory_space<vmem>>, vector<1x16xi32>
    %13 = vector.broadcast %12 : vector<1x16xi32> to vector<8x16xi32>
    %14 = vector.broadcast %11 : vector<8x1xi32> to vector<8x16xi32>
    %15 = arith.cmpi eq, %13, %14 : vector<8x16xi32>
    %c0_4 = arith.constant 0 : index
    %c0_5 = arith.constant 0 : index
    %16 = vector.load %arg3[%c0_4, %c0_5] : memref<8x16xf32, #tpu.memory_space<vmem>>, vector<8x16xf32>
    %cst = arith.constant 0.000000e+00 : f32
    %17 = vector.broadcast %cst : f32 to vector<8x16xf32>
    %18 = arith.select %15, %16, %17 : vector<8x16xi1>, vector<8x16xf32>
    %cst_6 = arith.constant dense<0.000000e+00> : vector<16xf32>
    %19 = vector.multi_reduction <add>, %18, %cst_6 [0] : vector<8x16xf32> to vector<16xf32>
    %20 = vector.shape_cast %19 : vector<16xf32> to vector<1x16xf32>
    %21 = vector.shape_cast %20 : vector<1x16xf32> to vector<1x1x16xf32>
    %c0_7 = arith.constant 0 : index
    %c0_8 = arith.constant 0 : index
    %c0_9 = arith.constant 0 : index
    %22 = vector.load %arg5[%c0_7, %c0_8, %c0_9] : memref<1x1x16xf32, #tpu.memory_space<vmem>>, vector<1x1x16xf32>
    tpu.vector_store %arg5[%c0_7, %c0_8, %c0_9], %21 {strides = array<i32>} : memref<1x1x16xf32, #tpu.memory_space<vmem>>, vector<1x1x16xf32>,
    return
  }
  func.func @transform_0(%arg0: i32, %arg1: i32) -> (i32, i32) {
    %c0_i32 = arith.constant 0 : i32
    %c0_i32_0 = arith.constant 0 : i32
    return %c0_i32, %arg1 : i32, i32
  }
  func.func @transform_1(%arg0: i32, %arg1: i32) -> (i32, i32) {
    %c0_i32 = arith.constant 0 : i32
    return %arg0, %arg1 : i32, i32
  }
  func.func @transform_2(%arg0: i32, %arg1: i32) -> (i32, i32) {
    %c0_i32 = arith.constant 0 : i32
    %c0_i32_0 = arith.constant 0 : i32
    return %arg0, %c0_i32 : i32, i32
  }
  func.func @transform_3(%arg0: i32, %arg1: i32) -> (i32, i32, i32) {
    %c0_i32 = arith.constant 0 : i32
    %c0_i32_0 = arith.constant 0 : i32
    return %arg0, %c0_i32, %arg1 : i32, i32, i32
  }
}

</mosaic_0001>

<bundles_post_ra>
// kernel: tpu_custom_call.1
= control target key start
LH: loop header
LB: loop body
LE: loop exit
PB: predicated region body
PF: predicated region fallthrough
CT: control target
= control target key end

     0   :  { %v88_v1 = vmov 0   ;;  %s131_s0 = inlined_call_operand.vmem [shape: s32[1,16], index: 0, kind: input, shape index: {}]   ;;  %s132_s1 = inlined_call_operand.vmem [shape: f32[8,16], index: 1, kind: input, shape index: {}]   ;;  %s133_s2 = inlined_call_operand.vmem [shape: s32[8,1], index: 2, kind: input, shape index: {}]   ;;  %s134_s3 = inlined_call_operand.hbm [shape: f32[1,1,16], index: 3, kind: output, shape index: {}]  }
   0x1   :  { %v16_v0 = vld [vmem:[%s133_s2] sm:$0xff]  ;;  %63 = vset.pattern.permute.xlu0 %v88_v1 }
   0x2   :  { %vm22_vm0 = vcmp.ne.s32.totalorder %v16_v0, 4294967196 }
   0x3   :  { %8 = vsyncpa [#allocation3], 0  ;;  %v24_v2 = vsel %vm22_vm0, %v16_v0, 4294967295  ;;  %v60_v3 = vld [vmem:[%s131_s0] ss:$0 sm:$0xff]  ;;  %vm36_vm1 = vcmask 130048  }
   0x4   :  { %31 = vperm.xlu0 %63, %v24_v2   ;;  %v34_v4 = vld [vmem:[%s132_s1] sm:$0xff]  ;;  %s89_s2 = smov [#allocation2]   ;;  %vm44_vm3 = vcmask 122880  }
   0x5   :  { %s52_s18 = sshll.u32 %s89_s2, 4  ;;  %s53_s18 = int_to_ptr.vmem [resolvable:$true] %s52_s18 }
   0x6   :  { %s64_s0 = scalar_lea.vmem %s53_s18, 16  ;;  %s68_s19 = scalar_lea.vmem %s53_s18, 32 }
   0x7   :  { %p65_p0 = scmp.ne.s32.totalorder %s53_s18, %s64_s0  ;;  %p69_p1 = scmp.lt.s32.totalorder %s53_s18, %s53_s18 }
   0x8   :  { %p70_p2 = scmp.lt.s32.totalorder %s68_s19, %s64_s0 }
   0xa   :  { %p71_p3 = por %p70_p2, %p69_p1 }
   0xc   :  { %p72_p4 = pnand %p71_p3, %p65_p0 }
  0x83   :  { %v32_v5 = vpop.permute.xlu0 %31 }
  0x84   :  { %vm33_vm2 = vcmp.eq.s32.totalorder %v60_v3, %v32_v5 }
  0x85   :  { %v35_v6 = vsel %vm33_vm2, %v34_v4, 0.0 }
  0x86   :  { %v37_v7 = vsel %vm36_vm1, %v35_v6, 0.0 }
  0x87   :  { %v38_v8 = vrot.slane %v37_v7, 4 }
  0x89   :  { %v39_v9 = vadd.f32 %v38_v8, %v37_v7 }
  0x8b   :  { %v40_v10 = vrot.slane %v39_v9, 2 }
  0x8d   :  { %v41_v11 = vadd.f32 %v40_v10, %v39_v9 }
  0x8f   :  { %v42_v12 = vrot.slane %v41_v11, 1 }
  0x91   :  { %v43_v13 = vadd.f32 %v42_v12, %v41_v11 }
  0x93   :  { %45 = vst.msk [vmem:[#allocation2] sm:$0x1] %vm44_vm3, %v43_v13 }
  0x94   :  { %75 = shalt.err (!%p72_p4)
}
  0x95   :  { %s76_s21 = scalar_lea.hbm %s134_s3, 16 }
  0x96   :  { %p77_p5 = scmp.ne.s32.totalorder %s134_s3, %s76_s21  ;;  %p80_p6 = scmp.lt.u32.totalorder %s76_s21, %s134_s3 }
  0x98   :  { %p82_p7 = pnand %p80_p6, %p77_p5 }
  0x9a   :  { %85 = shalt.err (!%p82_p7)
}
  0x9b   :  { %55 = dma.vmem_to_hbm [thread:$0]  %s53_s18, 16, %s134_s3, [#allocation3]  }
  0x9c   :  { %86 = dma.done.wait [#allocation3], 16  }
  0x9d   :  { %87 = vsyncadd [#allocation3], 4294967280 }
  0x9e   :  { %59 = vsyncpa [#allocation3], 1 }

</bundles_post_ra>
